<compile_context>
chip_gen: v7x
topology: tpu7x:2x2x1
jax: 0.10.0
libtpu: 0.0.40
codegen_flags: <defaults>
</compile_context>

<pallas_src>
import jax
import jax.numpy as jnp
from jax.experimental import pallas as pl
from jax.experimental.pallas import tpu as pltpu

# ---------------------------------------------------------------------------
# Problem sizes (small, consistent with the module's forward)
# ---------------------------------------------------------------------------
B = 2               # batch
C_IN = 3            # input channels (RGB)
T = 4               # num_frames
H = W = 16          # spatial
C_CONV = 8          # conv output channels
NUM_CLASSES = 10
KH = KW = 3         # conv kernel
THW = T * H * W     # per-(b, c) pixel count (1024) -> lane axis
K9 = KH * KW                    # 9 conv taps
K_ROWS = K9 * B * C_IN          # 54 im2col rows: (tap, batch, in-chan)
K_PAD = 56                      # padded to a multiple of the 8-sublane tile

# packed parameter-slab layout (all row starts 8-aligned)
SLAB_ROWS, SLAB_COLS = 80, 64
WF_R, CB_R, WC_R, FB_R = 0, 16, 32, 56


# ---------------------------------------------------------------------------
# Pallas kernel: whole batch in one gridless invocation
# ---------------------------------------------------------------------------
def spatial_stream_kernel(p_ref, prm_ref, o_ref):
    # p_ref  : (K_PAD, THW) = (56, 1024)  im2col patches, rows=(tap,b,c), lanes=(t,h,w)
    # prm_ref: (80, 64)                   packed parameters (single operand)
    # o_ref  : (B*NUM_CLASSES, 1)         logits column (wrapper reshape is free)
    wfull = prm_ref[WF_R:WF_R + B * C_CONV, 0:K_PAD]               # (16, 56) conv, block-diag
    cb    = prm_ref[CB_R:CB_R + B * C_CONV, 0:1]                   # (16, 1)  conv bias
    wc    = prm_ref[WC_R:WC_R + B * NUM_CLASSES, 0:B * C_CONV]     # (20, 16) fc,   block-diag
    fcb   = prm_ref[FB_R:FB_R + B * NUM_CLASSES, 0:1]              # (20, 1)  fc bias

    # 3x3 conv over all B*T frames as ONE lane-dense MXU matmul.
    act = jnp.dot(wfull, p_ref[...], preferred_element_type=jnp.float32)   # (16, 1024)
    act = jnp.maximum(act + cb, 0.0)                                       # bias + ReLU (VPU)

    # Classifier folded in front of the (linear) spatial+temporal mean:
    #   mean_n(Wc @ act) == Wc @ mean_n(act); rows are (batch, class), so the whole
    #   pooling is a single full-row lane reduction — no per-batch slices, no concat.
    z = jnp.dot(wc, act, preferred_element_type=jnp.float32)               # (20, 1024)
    o_ref[...] = jnp.mean(z, axis=1, keepdims=True) + fcb                  # (20, 1)


@jax.jit
def spatial_stream(x, conv_w, conv_b, fc_w, fc_b):
    """x: [B, 3, T, H, W] float32  ->  [B, NUM_CLASSES] float32."""
    # ---- im2col WITHOUT any transpose: pad, 9 shifted views stacked on a leading
    # ---- tap axis, reshape.  Lane axis stays the original contiguous (t, h, w).
    x_pad = jnp.pad(x, ((0, 0), (0, 0), (0, 0), (1, 1), (1, 1)))           # (B,C,T,H+2,W+2)
    views = [x_pad[:, :, :, dh:dh + H, dw:dw + W]
             for dh in range(KH) for dw in range(KW)]                      # 9 x (B,C,T,H,W)
    patches = jnp.stack(views, axis=0).reshape(K_ROWS, THW)                # (54, 1024)
    patches = jnp.pad(patches, ((0, K_PAD - K_ROWS), (0, 0)))              # (56, 1024)

    # ---- pack ALL parameters into one slab (one DMA instead of four) ----
    eye_b = jnp.eye(B, dtype=jnp.float32)
    w9 = conv_w.reshape(K9, C_IN, C_CONV)
    # wfull[b*C_CONV+o, (k*B+d)*C_IN+c] = conv_w[k][c, o] * (b == d)
    wfull = jnp.einsum('kco,bd->bokdc', w9, eye_b).reshape(B * C_CONV, K_ROWS)
    # wc[b*NC+j, d*C_CONV+o] = fc_w[o, j] * (b == d)
    wc = jnp.einsum('oj,bd->bjdo', fc_w, eye_b).reshape(B * NUM_CLASSES, B * C_CONV)
    cbf = jnp.tile(conv_b, B).reshape(B * C_CONV, 1)
    fcb = jnp.tile(fc_b, B).reshape(B * NUM_CLASSES, 1)

    slab = jnp.zeros((SLAB_ROWS, SLAB_COLS), jnp.float32)
    slab = slab.at[WF_R:WF_R + B * C_CONV, 0:K_ROWS].set(wfull)
    slab = slab.at[CB_R:CB_R + B * C_CONV, 0:1].set(cbf)
    slab = slab.at[WC_R:WC_R + B * NUM_CLASSES, 0:B * C_CONV].set(wc)
    slab = slab.at[FB_R:FB_R + B * NUM_CLASSES, 0:1].set(fcb)

    out_col = pl.pallas_call(
        spatial_stream_kernel,
        out_shape=jax.ShapeDtypeStruct((B * NUM_CLASSES, 1), jnp.float32),
        in_specs=[pl.BlockSpec(memory_space=pltpu.MemorySpace.VMEM)] * 2,
        out_specs=pl.BlockSpec(memory_space=pltpu.MemorySpace.VMEM),
    )(patches, slab)

    return out_col.reshape(B, NUM_CLASSES)                                 # free reshape


# ---------------------------------------------------------------------------
# Pure-JAX reference (same semantics as the PyTorch forward)
# ---------------------------------------------------------------------------
def reference(x, conv_w, conv_b, fc_w, fc_b):
    b, c, t, h, w = x.shape
    xf = jnp.transpose(x, (0, 2, 3, 4, 1)).reshape(b * t, h, w, c)         # NHWC frames
    y = jax.lax.conv_general_dilated(
        xf, conv_w, window_strides=(1, 1), padding="SAME",
        dimension_numbers=("NHWC", "HWIO", "NHWC"))
    y = jax.nn.relu(y + conv_b.reshape(1, 1, 1, -1))
    pooled = y.mean(axis=(1, 2))                                           # (B*T, C_CONV)
    logits = pooled @ fc_w + fc_b.reshape(1, -1)                           # (B*T, NC)
    return logits.reshape(b, t, -1).mean(axis=1)                           # (B, NC)


if __name__ == "__main__":
    key = jax.random.PRNGKey(0)
    kx, kcw, kcb, kfw, kfb = jax.random.split(key, 5)

    x = jax.random.normal(kx, (B, C_IN, T, H, W), dtype=jnp.float32)
    conv_w = jax.random.normal(kcw, (KH, KW, C_IN, C_CONV), dtype=jnp.float32) * 0.1
    conv_b = jax.random.normal(kcb, (C_CONV,), dtype=jnp.float32) * 0.1
    fc_w = jax.random.normal(kfw, (C_CONV, NUM_CLASSES), dtype=jnp.float32) * 0.1
    fc_b = jax.random.normal(kfb, (NUM_CLASSES,), dtype=jnp.float32) * 0.1

    out = spatial_stream(x, conv_w, conv_b, fc_w, fc_b)
    out = jax.block_until_ready(out)

    ref = reference(x, conv_w, conv_b, fc_w, fc_b)
    assert out.shape == (B, NUM_CLASSES), out.shape
    assert jnp.allclose(out, ref, atol=1e-4, rtol=1e-4), (out, ref)

    print("KERNEL_OK")
</pallas_src>

<mosaic_0001>
module attributes {stable_mosaic.version = 11 : i64} {
  func.func @spatial_stream_kernel(%arg0: memref<56x1024xf32, #tpu.memory_space<vmem>>, %arg1: memref<80x64xf32, #tpu.memory_space<vmem>>, %arg2: memref<20x1xf32, #tpu.memory_space<vmem>>) attributes {dimension_semantics = [], scalar_prefetch = 0 : i64, scratch_operands = 0 : i64, tpu.core_type = #tpu.core_type<tc>} {
    %c0 = arith.constant 0 : index
    %c0_0 = arith.constant 0 : index
    %0 = vector.load %arg1[%c0, %c0_0] : memref<80x64xf32, #tpu.memory_space<vmem>>, vector<16x56xf32>
    %c16 = arith.constant 16 : index
    %c0_1 = arith.constant 0 : index
    %1 = vector.load %arg1[%c16, %c0_1] : memref<80x64xf32, #tpu.memory_space<vmem>>, vector<16x1xf32>
    %c32 = arith.constant 32 : index
    %c0_2 = arith.constant 0 : index
    %2 = vector.load %arg1[%c32, %c0_2] : memref<80x64xf32, #tpu.memory_space<vmem>>, vector<20x16xf32>
    %c56 = arith.constant 56 : index
    %c0_3 = arith.constant 0 : index
    %3 = vector.load %arg1[%c56, %c0_3] : memref<80x64xf32, #tpu.memory_space<vmem>>, vector<20x1xf32>
    %c0_4 = arith.constant 0 : index
    %c0_5 = arith.constant 0 : index
    %4 = vector.load %arg0[%c0_4, %c0_5] : memref<56x1024xf32, #tpu.memory_space<vmem>>, vector<56x1024xf32>
    %cst = arith.constant dense<0.000000e+00> : vector<16x1024xf32>
    %5 = tpu.matmul %0, %4, %cst {dimension_numbers = #tpu.dot_dimension_numbers<[1], [0], [0], [1], [0, 0, 1, 1], [], []>} : vector<16x56xf32>, vector<56x1024xf32>, vector<16x1024xf32> -> vector<16x1024xf32>
    %6 = vector.broadcast %1 : vector<16x1xf32> to vector<16x1024xf32>
    %7 = arith.addf %5, %6 : vector<16x1024xf32>
    %cst_6 = arith.constant 0.000000e+00 : f32
    %8 = vector.broadcast %cst_6 : f32 to vector<16x1024xf32>
    %9 = arith.maximumf %7, %8 : vector<16x1024xf32>
    %cst_7 = arith.constant dense<0.000000e+00> : vector<20x1024xf32>
    %10 = tpu.matmul %2, %9, %cst_7 {dimension_numbers = #tpu.dot_dimension_numbers<[1], [0], [0], [1], [0, 0, 1, 1], [], []>} : vector<20x16xf32>, vector<16x1024xf32>, vector<20x1024xf32> -> vector<20x1024xf32>
    %cst_8 = arith.constant dense<0.000000e+00> : vector<20xf32>
    %11 = vector.multi_reduction <add>, %10, %cst_8 [1] : vector<20x1024xf32> to vector<20xf32>
    %12 = vector.shape_cast %11 : vector<20xf32> to vector<20x1xf32>
    %cst_9 = arith.constant 1.024000e+03 : f32
    %13 = vector.broadcast %cst_9 : f32 to vector<20x1xf32>
    %14 = arith.divf %12, %13 : vector<20x1xf32>
    %15 = arith.addf %14, %3 : vector<20x1xf32>
    %c0_10 = arith.constant 0 : index
    %c0_11 = arith.constant 0 : index
    %16 = vector.load %arg2[%c0_10, %c0_11] : memref<20x1xf32, #tpu.memory_space<vmem>>, vector<20x1xf32>
    tpu.vector_store %arg2[%c0_10, %c0_11], %15 {strides = array<i32>} : memref<20x1xf32, #tpu.memory_space<vmem>>, vector<20x1xf32>,
    return
  }
}

</mosaic_0001>

<bundles_post_ra>
// kernel: tile.13
= control target key start
LH: loop header
LB: loop body
LE: loop exit
PB: predicated region body
PF: predicated region fallthrough
CT: control target
= control target key end

     0   :  { %s22_s0 = inlined_call_operand.vmem [shape: f32[8], index: 0, kind: input, shape index: {}]   ;;  %s23_s1 = inlined_call_operand.vmem [shape: f32[2,8], index: 1, kind: output, shape index: {}]  }
   0x1   :  { %v4_v0 = vld [vmem:[%s22_s0] ss:$0 sm:$0xff] }
   0x2   :  { %5 = vst [vmem:[%s23_s1] sm:$0x3] %v4_v0 }

// kernel: tile.18
= control target key start
LH: loop header
LB: loop body
LE: loop exit
PB: predicated region body
PF: predicated region fallthrough
CT: control target
= control target key end

     0   :  { %s22_s0 = inlined_call_operand.vmem [shape: f32[10], index: 0, kind: input, shape index: {}]   ;;  %s23_s1 = inlined_call_operand.vmem [shape: f32[2,10], index: 1, kind: output, shape index: {}]  }
   0x1   :  { %v4_v0 = vld [vmem:[%s22_s0] ss:$0 sm:$0xff] }
   0x2   :  { %5 = vst [vmem:[%s23_s1] sm:$0x3] %v4_v0 }

// kernel: spatial_stream.1
= control target key start
LH: loop header
LB: loop body
LE: loop exit
PB: predicated region body
PF: predicated region fallthrough
CT: control target
= control target key end

     0   :  { %v899_v3 = vmov 0.0   ;;  %v900_v8 = vmov 0   ;;  %vm87_vm0 = vcmask 457728   ;;  %vm418_vm1 = vcmask 130048   ;;  %s1177_s0 = inlined_call_operand.vmem [shape: f32[56,1024], index: 0, kind: input, shape index: {}]   ;;  %s1178_s1 = inlined_call_operand.vmem [shape: f32[80,64], index: 1, kind: input, shape index: {}]   ;;  %s1179_s2 = inlined_call_operand.vmem [shape: f32[20,1], index: 2, kind: output, shape index: {}]  }
   0x1   :  { %v22_v0 = vld [vmem:[%s1177_s0 + $0x8] sm:$0xff]  ;;  %v24_v2 = vld [vmem:[%s1177_s0 + $0x18] sm:$0xff]  ;;  %158 = vmatprep.mubr.f32.mxu0 %v899_v3  ;;  %235 = vmatprep.mubr.f32.mxu1 %v899_v3  ;;  %v21_v6 = vld [vmem:[%s1177_s0] sm:$0xff]  ;;  %vm778_vm2 = vcmask 1043456   ;;  %vm803_vm3 = vcmask 7168   ;;  %vm806_vm4 = vcmask 3072  }
   0x2   :  { %v30_v1 = vld [vmem:[%s1177_s0 + $0x48] sm:$0xff]  ;;  %v32_v5 = vld [vmem:[%s1177_s0 + $0x58] sm:$0xff]  ;;  %v29_v7 = vld [vmem:[%s1177_s0 + $0x40] sm:$0xff]  ;;  %898 = vset.pattern.permute.xlu0 %v900_v8 }
   0x3   :  { %v832_v4 = vpack.c.bf16 %v30_v1, %v22_v0  ;;  %v844_v9 = vpack.c.bf16 %v32_v5, %v24_v2  ;;  %v834_v10 = vpack.c.bf16 %v29_v7, %v21_v6  ;;  %v23_v11 = vld [vmem:[%s1177_s0 + $0x10] sm:$0xff]  ;;  %v38_v13 = vld [vmem:[%s1177_s0 + $0x88] sm:$0xff]  ;;  %v40_v16 = vld [vmem:[%s1177_s0 + $0x98] sm:$0xff] }
   0x4   :  { %v31_v12 = vld [vmem:[%s1177_s0 + $0x50] sm:$0xff]  ;;  %v46_v15 = vld [vmem:[%s1177_s0 + $0xc8] sm:$0xff]  ;;  %v48_v17 = vld [vmem:[%s1177_s0 + $0xd8] sm:$0xff] }
   0x5   :  { %833 = vmatprep.subr.bf16.mxu0 %v832_v4  ;;  %v846_v14 = vpack.c.bf16 %v31_v12, %v23_v11  ;;  %845 = vmatprep.subr.bf16.mxu1 %v844_v9  ;;  %v836_v18 = vpack.c.bf16 %v46_v15, %v38_v13  ;;  %v848_v19 = vpack.c.bf16 %v48_v17, %v40_v16  ;;  %v37_v20 = vld [vmem:[%s1177_s0 + $0x80] sm:$0xff]  ;;  %v39_v22 = vld [vmem:[%s1177_s0 + $0x90] sm:$0xff]  ;;  %v54_v25 = vld [vmem:[%s1177_s0 + $0x108] sm:$0xff] }
   0x6   :  { %835 = vmatpush1.bf16.msra.mxu0 %v834_v10  ;;  %v45_v21 = vld [vmem:[%s1177_s0 + $0xc0] sm:$0xff]  ;;  %v47_v24 = vld [vmem:[%s1177_s0 + $0xd0] sm:$0xff]  ;;  %v62_v26 = vld [vmem:[%s1177_s0 + $0x148] sm:$0xff] }
   0x7   :  { %847 = vmatpush1.bf16.msra.mxu1 %v846_v14  ;;  %v838_v23 = vpack.c.bf16 %v45_v21, %v37_v20  ;;  %837 = vmatprep.subr.bf16.mxu0 %v836_v18  ;;  %v850_v27 = vpack.c.bf16 %v47_v24, %v39_v22  ;;  %v840_v28 = vpack.c.bf16 %v62_v26, %v54_v25  ;;  %v56_v29 = vld [vmem:[%s1177_s0 + $0x118] sm:$0xff]  ;;  %v53_v31 = vld [vmem:[%s1177_s0 + $0x100] sm:$0xff]  ;;  %v55_v34 = vld [vmem:[%s1177_s0 + $0x110] sm:$0xff] }
   0x8   :  { %849 = vmatprep.subr.bf16.mxu1 %v848_v19  ;;  %v64_v30 = vld [vmem:[%s1177_s0 + $0x158] sm:$0xff]  ;;  %v61_v33 = vld [vmem:[%s1177_s0 + $0x140] sm:$0xff]  ;;  %v63_v35 = vld [vmem:[%s1177_s0 + $0x150] sm:$0xff] }
   0x9   :  { %v852_v32 = vpack.c.bf16 %v64_v30, %v56_v29  ;;  %v842_v36 = vpack.c.bf16 %v61_v33, %v53_v31  ;;  %v854_v37 = vpack.c.bf16 %v63_v35, %v55_v34  ;;  %v70_v38 = vld [vmem:[%s1177_s0 + $0x188] sm:$0xff]  ;;  %v72_v39 = vld [vmem:[%s1177_s0 + $0x198] sm:$0xff]  ;;  %v25_v44 = vld [vmem:[%s1177_s0 + $0x20] sm:$0xff] }
   0xa   :  { %839 = vmatpush1.bf16.msra.mxu0 %v838_v23  ;;  %v26_v40 = vld [vmem:[%s1177_s0 + $0x28] sm:$0xff]  ;;  %v28_v42 = vld [vmem:[%s1177_s0 + $0x38] sm:$0xff]  ;;  %v33_v45 = vld [vmem:[%s1177_s0 + $0x60] sm:$0xff] }
   0xb   :  { %851 = vmatpush1.bf16.msra.mxu1 %v850_v27  ;;  %841 = vmatprep.subr.bf16.mxu0 %v840_v28  ;;  %v34_v41 = vld [vmem:[%s1177_s0 + $0x68] sm:$0xff]  ;;  %v36_v43 = vld [vmem:[%s1177_s0 + $0x78] sm:$0xff]  ;;  %v69_v46 = vld [vmem:[%s1177_s0 + $0x180] sm:$0xff]  ;;  %v858_v54 = vpack.c.bf16 %v33_v45, %v25_v44 }
   0xc   :  { %853 = vmatprep.subr.bf16.mxu1 %v852_v32  ;;  %v27_v47 = vld [vmem:[%s1177_s0 + $0x30] sm:$0xff]  ;;  %v1029_v50 = vld [vmem:[%s1178_s1] sm:$0xff]  ;;  %v856_v51 = vpack.c.bf16 %v34_v41, %v26_v40  ;;  %v42_v52 = vld [vmem:[%s1177_s0 + $0xa8] sm:$0xff]  ;;  %v868_v53 = vpack.c.bf16 %v36_v43, %v28_v42 }
   0xd   :  { %v35_v48 = vld [vmem:[%s1177_s0 + $0x70] sm:$0xff]  ;;  %v50_v55 = vld [vmem:[%s1177_s0 + $0xe8] sm:$0xff]  ;;  %v44_v56 = vld [vmem:[%s1177_s0 + $0xb8] sm:$0xff] }
   0xe   :  { %843 = vmatpush1.bf16.msra.mxu0 %v842_v36  ;;  %v71_v49 = vld [vmem:[%s1177_s0 + $0x190] sm:$0xff]  ;;  %v52_v57 = vld [vmem:[%s1177_s0 + $0xf8] sm:$0xff]  ;;  %v870_v58 = vpack.c.bf16 %v35_v48, %v27_v47  ;;  %v41_v59 = vld [vmem:[%s1177_s0 + $0xa0] sm:$0xff]  ;;  %v860_v2 = vpack.c.bf16 %v50_v55, %v42_v52 }
   0xf   :  { %855 = vmatpush1.bf16.msra.mxu1 %v854_v37  ;;  %106 = vmatprep.subr.mxu0 %v70_v38  ;;  %v49_v60 = vld [vmem:[%s1177_s0 + $0xe0] sm:$0xff]  ;;  %v43_v61 = vld [vmem:[%s1177_s0 + $0xb0] sm:$0xff]  ;;  %v58_v63 = vld [vmem:[%s1177_s0 + $0x128] sm:$0xff]  ;;  %v872_v6 = vpack.c.bf16 %v52_v57, %v44_v56 }
  0x10   :  { %183 = vmatprep.subr.mxu1 %v72_v39  ;;  %v51_v62 = vld [vmem:[%s1177_s0 + $0xf0] sm:$0xff]  ;;  %v66_v0 = vld [vmem:[%s1177_s0 + $0x168] sm:$0xff]  ;;  %v60_v4 = vld [vmem:[%s1177_s0 + $0x138] sm:$0xff]  ;;  %v862_v7 = vpack.c.bf16 %v49_v60, %v41_v59 }
  0x11   :  { %v12_v1 = vld [vmem:[%s1178_s1 + $0x8] sm:$0xff]  ;;  %v68_v5 = vld [vmem:[%s1177_s0 + $0x178] sm:$0xff]  ;;  %v874_v8 = vpack.c.bf16 %v51_v62, %v43_v61  ;;  %v864_v9 = vpack.c.bf16 %v66_v0, %v58_v63  ;;  %v57_v10 = vld [vmem:[%s1177_s0 + $0x120] sm:$0xff] }
  0x12   :  { %107 = vmatpush1.msra.mxu0 %v69_v46  ;;  %v65_v11 = vld [vmem:[%s1177_s0 + $0x160] sm:$0xff]  ;;  %v876_v12 = vpack.c.bf16 %v68_v5, %v60_v4  ;;  %v59_v13 = vld [vmem:[%s1177_s0 + $0x130] sm:$0xff]  ;;  %v74_v18 = vld [vmem:[%s1177_s0 + $0x1a8] sm:$0xff] }
  0x13   :  { %184 = vmatpush1.msra.mxu1 %v71_v49  ;;  %812 = vmatmul.mubr.msk.f32.vlgmr.msra.gmra.mrb[0].mxu0 %vm87_vm0, %v1029_v50  ;;  %v67_v14 = vld [vmem:[%s1177_s0 + $0x170] sm:$0xff]  ;;  %v866_v15 = vpack.c.bf16 %v65_v11, %v57_v10  ;;  %v76_v19 = vld [vmem:[%s1177_s0 + $0x1b8] sm:$0xff]  ;;  %v73_v21 = vld [vmem:[%s1177_s0 + $0x1a0] sm:$0xff] }
  0x14   :  { %814 = vmatmul.mubr.msk.f32.vlgmr.msra.gmra.mrb[0].mxu1 %vm87_vm0, %v1029_v50  ;;  %857 = vmatprep.subr.bf16.mxu0 %v856_v51  ;;  %v13_v16 = vld [vmem:[%s1178_s1 + $0x10] sm:$0xff]  ;;  %v878_v17 = vpack.c.bf16 %v67_v14, %v59_v13  ;;  %v14_v20 = vld [vmem:[%s1178_s1 + $0x18] sm:$0xff] }
  0x15   :  { %869 = vmatprep.subr.bf16.mxu1 %v868_v53  ;;  %859 = vmatpush1.bf16.msra.mxu0 %v858_v54  ;;  %v75_v22 = vld [vmem:[%s1177_s0 + $0x1b0] sm:$0xff]  ;;  %v15_v53 = vld [vmem:[%s1178_s1 + $0x20] sm:$0xff] }
  0x16   :  { %871 = vmatpush1.bf16.msra.mxu1 %v870_v58  ;;  %164 = vmatprep.mubr.f32.mxu0 %v899_v3  ;;  %v16_v58 = vld [vmem:[%s1178_s1 + $0x28] sm:$0xff] }
  0x17   :  { %241 = vmatprep.mubr.f32.mxu1 %v899_v3  ;;  %813 = vmatmul.mubr.msk.f32.gmra.mrb[2].mxu0 %vm87_vm0, %v12_v1 }
  0x18   :  { %815 = vmatmul.mubr.msk.f32.gmra.mrb[2].mxu1 %vm87_vm0, %v12_v1  ;;  %861 = vmatprep.subr.bf16.mxu0 %v860_v2 }
  0x19   :  { %873 = vmatprep.subr.bf16.mxu1 %v872_v6  ;;  %863 = vmatpush1.bf16.msra.mxu0 %v862_v7  ;;  %v17_v7 = vld [vmem:[%s1178_s1 + $0x30] sm:$0xf] }
  0x1a   :  { %875 = vmatpush1.bf16.msra.mxu1 %v874_v8  ;;  %865 = vmatprep.subr.bf16.mxu0 %v864_v9 }
  0x1b   :  { %877 = vmatprep.subr.bf16.mxu1 %v876_v12  ;;  %312 = vmatprep.mubr.f32.mxu0 %v899_v3 }
  0x1c   :  { %389 = vmatprep.mubr.f32.mxu1 %v899_v3  ;;  %79 = vperm.xlu0 %898, %v13_v16  }
  0x1d   :  { %867 = vmatpush1.bf16.msra.mxu0 %v866_v15 }
  0x1e   :  { %879 = vmatpush1.bf16.msra.mxu1 %v878_v17  ;;  %260 = vmatprep.subr.mxu0 %v74_v18 }
  0x1f   :  { %337 = vmatprep.subr.mxu1 %v76_v19 }
  0x20   :  { %84 = vperm.xlu0 %898, %v14_v20  }
  0x21   :  { %261 = vmatpush1.msra.mxu0 %v73_v21 }
  0x22   :  { %338 = vmatpush1.msra.mxu1 %v75_v22  ;;  %816 = vmatmul.mubr.msk.f32.vlgmr.msra.gmra.mrb[4].mxu0 %vm87_vm0, %v1029_v50 }
  0x23   :  { %818 = vmatmul.mubr.msk.f32.vlgmr.msra.gmra.mrb[4].mxu1 %vm87_vm0, %v1029_v50  ;;  %318 = vmatprep.mubr.f32.mxu0 %v899_v3 }
  0x24   :  { %395 = vmatprep.mubr.f32.mxu1 %v899_v3 }
  0x26   :  { %817 = vmatmul.mubr.msk.f32.gmra.mrb[6].mxu0 %vm87_vm0, %v12_v1 }
  0x27   :  { %819 = vmatmul.mubr.msk.f32.gmra.mrb[6].mxu1 %vm87_vm0, %v12_v1  ;;  %492 = vmatprep.mubr.f32.mxu0 %v899_v3 }
  0x28   :  { %575 = vmatprep.mubr.f32.mxu1 %v899_v3 }
  0x9b   :  { %v80_v23 = vpop.permute.xlu0 %79 }
  0x9f   :  { %v85_v29 = vpop.permute.xlu0 %84 }
  0xe6   :  { %v160_v24 = vpop.f32.mrb[0].mxu0 }
  0xe7   :  { %v162_v25 = vpop.f32.mrb[1].mxu0  ;;  %v237_v26 = vpop.f32.mrb[0].mxu1  ;;  %v161_v30 = vadd.f32 %v160_v24, %v80_v23 }
  0xe8   :  { %v238_v27 = vadd.f32 %v237_v26, %v80_v23  ;;  %v239_v28 = vpop.f32.mrb[1].mxu1  ;;  %v163_v31 = vadd.f32 %v162_v25, %v80_v23 }
  0xe9   :  { %v240_v33 = vadd.f32 %v239_v28, %v80_v23  ;;  %v402_v41 = vmax.f32 %v161_v30, 0.0 }
  0xea   :  { %v166_v32 = vpop.f32.mrb[2].mxu0  ;;  %v404_v37 = vmax.f32 %v238_v27, 0.0  ;;  %v403_v44 = vmax.f32 %v163_v31, 0.0 }
  0xeb   :  { %v167_v34 = vadd.f32 %v166_v32, %v85_v29  ;;  %v243_v35 = vpop.f32.mrb[2].mxu1  ;;  %v168_v36 = vpop.f32.mrb[3].mxu0  ;;  %v405_v47 = vmax.f32 %v240_v33, 0.0 }
  0xec   :  { %v244_v38 = vadd.f32 %v243_v35, %v85_v29  ;;  %v169_v39 = vadd.f32 %v168_v36, %v85_v29  ;;  %v245_v40 = vpop.f32.mrb[3].mxu1 }
  0xed   :  { %v410_v42 = vmax.f32 %v167_v34, 0.0  ;;  %v246_v43 = vadd.f32 %v245_v40, %v85_v29 }
  0xee   :  { %v412_v45 = vmax.f32 %v244_v38, 0.0  ;;  %v411_v46 = vmax.f32 %v169_v39, 0.0 }
  0xef   :  { %v882_v48 = vpack.c.bf16 %v410_v42, %v402_v41  ;;  %v413_v49 = vmax.f32 %v246_v43, 0.0 }
  0xf0   :  { %v886_v50 = vpack.c.bf16 %v412_v45, %v404_v37  ;;  %v880_v51 = vpack.c.bf16 %v411_v46, %v403_v44 }
  0xf1   :  { %v884_v52 = vpack.c.bf16 %v413_v49, %v405_v47 }
  0xf2   :  { %881 = vmatprep.subr.bf16.mxu0 %v880_v51 }
  0xf3   :  { %885 = vmatprep.subr.bf16.mxu1 %v884_v52  ;;  %883 = vmatpush1.bf16.msra.mxu0 %v882_v48 }
  0xf4   :  { %887 = vmatpush1.bf16.msra.mxu1 %v886_v50 }
  0xf5   :  { %v314_v54 = vpop.f32.mrb[4].mxu0 }
  0xf6   :  { %v391_v55 = vpop.f32.mrb[4].mxu1  ;;  %v316_v56 = vpop.f32.mrb[5].mxu0  ;;  %820 = vmatmul.mubr.msk.f32.vlgmr.msra.gmra.mrb[8].mxu0 %vm418_vm1, %v15_v53  ;;  %v315_v59 = vadd.f32 %v314_v54, %v80_v23 }
  0xf7   :  { %v393_v57 = vpop.f32.mrb[5].mxu1  ;;  %498 = vmatprep.mubr.f32.mxu0 %v899_v3  ;;  %823 = vmatmul.mubr.msk.f32.vlgmr.msra.gmra.mrb[8].mxu1 %vm418_vm1, %v15_v53  ;;  %v392_v60 = vadd.f32 %v391_v55, %v80_v23  ;;  %v317_v61 = vadd.f32 %v316_v56, %v80_v23 }
  0xf8   :  { %581 = vmatprep.mubr.f32.mxu1 %v899_v3  ;;  %v394_v63 = vadd.f32 %v393_v57, %v80_v23  ;;  %v406_v8 = vmax.f32 %v315_v59, 0.0 }
  0xf9   :  { %v320_v62 = vpop.f32.mrb[6].mxu0  ;;  %v408_v11 = vmax.f32 %v392_v60, 0.0  ;;  %v407_v12 = vmax.f32 %v317_v61, 0.0 }
  0xfa   :  { %v321_v0 = vadd.f32 %v320_v62, %v85_v29  ;;  %v397_v1 = vpop.f32.mrb[6].mxu1  ;;  %v322_v2 = vpop.f32.mrb[7].mxu0  ;;  %821 = vmatmul.mubr.msk.f32.gmra.mrb[10].mxu0 %vm418_vm1, %v16_v58  ;;  %v409_v15 = vmax.f32 %v394_v63, 0.0 }
  0xfb   :  { %v398_v4 = vadd.f32 %v397_v1, %v85_v29  ;;  %v323_v5 = vadd.f32 %v322_v2, %v85_v29  ;;  %v399_v6 = vpop.f32.mrb[7].mxu1  ;;  %504 = vmatprep.mubr.f32.mxu0 %v899_v3  ;;  %824 = vmatmul.mubr.msk.f32.gmra.mrb[10].mxu1 %vm418_vm1, %v16_v58 }
  0xfc   :  { %v414_v9 = vmax.f32 %v321_v0, 0.0  ;;  %v400_v10 = vadd.f32 %v399_v6, %v85_v29  ;;  %587 = vmatprep.mubr.f32.mxu1 %v899_v3 }
  0xfd   :  { %v416_v13 = vmax.f32 %v398_v4, 0.0  ;;  %v415_v14 = vmax.f32 %v323_v5, 0.0 }
  0xfe   :  { %v890_v16 = vpack.c.bf16 %v414_v9, %v406_v8  ;;  %v417_v17 = vmax.f32 %v400_v10, 0.0  ;;  %822 = vmatmul.mubr.msk.f32.gmra.mrb[12].mxu0 %vm418_vm1, %v17_v7  ;;  %v18_v10 = vld [vmem:[%s1178_s1 + $0x38] sm:$0xff] }
  0xff   :  { %v894_v18 = vpack.c.bf16 %v416_v13, %v408_v11  ;;  %v888_v19 = vpack.c.bf16 %v415_v14, %v407_v12  ;;  %658 = vmatprep.mubr.f32.mxu0 %v899_v3  ;;  %825 = vmatmul.mubr.msk.f32.gmra.mrb[12].mxu1 %vm418_vm1, %v17_v7  ;;  %v19_v14 = vld [vmem:[%s1178_s1 + $0x40] sm:$0xff] }
 0x100   :  { %v892_v20 = vpack.c.bf16 %v417_v17, %v409_v15  ;;  %741 = vmatprep.mubr.f32.mxu1 %v899_v3 }
 0x101   :  { %889 = vmatprep.subr.bf16.mxu0 %v888_v19 }
 0x102   :  { %893 = vmatprep.subr.bf16.mxu1 %v892_v20  ;;  %891 = vmatpush1.bf16.msra.mxu0 %v890_v16 }
 0x103   :  { %895 = vmatpush1.bf16.msra.mxu1 %v894_v18  ;;  %v20_v18 = vld [vmem:[%s1178_s1 + $0x48] sm:$0xf] }
 0x105   :  { %826 = vmatmul.mubr.msk.f32.vlgmr.msra.gmra.mrb[14].mxu0 %vm418_vm1, %v15_v53 }
 0x106   :  { %664 = vmatprep.mubr.f32.mxu0 %v899_v3  ;;  %829 = vmatmul.mubr.msk.f32.vlgmr.msra.gmra.mrb[14].mxu1 %vm418_vm1, %v15_v53 }
 0x107   :  { %747 = vmatprep.mubr.f32.mxu1 %v899_v3 }
 0x109   :  { %827 = vmatmul.mubr.msk.f32.gmra.mrb[16].mxu0 %vm418_vm1, %v16_v58 }
 0x10a   :  { %670 = vmatprep.mubr.f32.mxu0 %v899_v3  ;;  %830 = vmatmul.mubr.msk.f32.gmra.mrb[16].mxu1 %vm418_vm1, %v16_v58 }
 0x10b   :  { %753 = vmatprep.mubr.f32.mxu1 %v899_v3 }
 0x10d   :  { %828 = vmatmul.mubr.msk.f32.gmra.mrb[18].mxu0 %vm418_vm1, %v17_v7 }
 0x10e   :  { %831 = vmatmul.mubr.msk.f32.gmra.mrb[18].mxu1 %vm418_vm1, %v17_v7 }
 0x1c9   :  { %v494_v21 = vpop.f32.mrb[8].mxu0 }
 0x1ca   :  { %v496_v22 = vpop.f32.mrb[9].mxu0  ;;  %v577_v23 = vpop.f32.mrb[8].mxu1 }
 0x1cb   :  { %v760_v24 = vadd.f32 %v496_v22, %v494_v21  ;;  %v579_v25 = vpop.f32.mrb[9].mxu1 }
 0x1cd   :  { %v500_v26 = vpop.f32.mrb[10].mxu0  ;;  %v761_v27 = vadd.f32 %v760_v24, %v577_v23 }
 0x1ce   :  { %v502_v28 = vpop.f32.mrb[11].mxu0  ;;  %v583_v29 = vpop.f32.mrb[10].mxu1 }
 0x1cf   :  { %v769_v30 = vadd.f32 %v502_v28, %v500_v26  ;;  %v762_v31 = vadd.f32 %v761_v27, %v579_v25  ;;  %v585_v32 = vpop.f32.mrb[11].mxu1 }
 0x1d1   :  { %v506_v33 = vpop.f32.mrb[12].mxu0  ;;  %v770_v34 = vadd.f32 %v769_v30, %v583_v29 }
 0x1d2   :  { %v779_v3 = vsel %vm778_vm2, %v506_v33, 0.0  ;;  %v508_v35 = vpop.f32.mrb[13].mxu0  ;;  %v589_v36 = vpop.f32.mrb[12].mxu1 }
 0x1d3   :  { %v780_v37 = vsel %vm778_vm2, %v508_v35, 0.0  ;;  %v771_v38 = vadd.f32 %v770_v34, %v585_v32  ;;  %v782_v39 = vsel %vm778_vm2, %v589_v36, 0.0  ;;  %v591_v40 = vpop.f32.mrb[13].mxu1 }
 0x1d4   :  { %v781_v41 = vadd.f32 %v780_v37, %v779_v3  ;;  %v784_v42 = vsel %vm778_vm2, %v591_v40, 0.0 }
 0x1d6   :  { %v783_v43 = vadd.f32 %v782_v39, %v781_v41 }
 0x1d8   :  { %v660_v44 = vpop.f32.mrb[14].mxu0  ;;  %v785_v45 = vadd.f32 %v784_v42, %v783_v43 }
 0x1d9   :  { %v763_v46 = vadd.f32 %v762_v31, %v660_v44  ;;  %v662_v47 = vpop.f32.mrb[15].mxu0  ;;  %v743_v48 = vpop.f32.mrb[14].mxu1 }
 0x1da   :  { %v745_v49 = vpop.f32.mrb[15].mxu1 }
 0x1db   :  { %v764_v50 = vadd.f32 %v763_v46, %v662_v47 }
 0x1dc   :  { %v666_v51 = vpop.f32.mrb[16].mxu0 }
 0x1dd   :  { %v772_v52 = vadd.f32 %v771_v38, %v666_v51  ;;  %v765_v53 = vadd.f32 %v764_v50, %v743_v48  ;;  %v668_v54 = vpop.f32.mrb[17].mxu0  ;;  %v749_v55 = vpop.f32.mrb[16].mxu1 }
 0x1de   :  { %v751_v56 = vpop.f32.mrb[17].mxu1 }
 0x1df   :  { %v773_v57 = vadd.f32 %v772_v52, %v668_v54  ;;  %v766_v58 = vadd.f32 %v765_v53, %v745_v49 }
 0x1e0   :  { %v672_v59 = vpop.f32.mrb[18].mxu0 }
 0x1e1   :  { %v786_v60 = vsel %vm778_vm2, %v672_v59, 0.0  ;;  %v774_v61 = vadd.f32 %v773_v57, %v749_v55  ;;  %767 = vadd.xlane.f32.xlu1 %v766_v58  ;;  %v674_v62 = vpop.f32.mrb[19].mxu0  ;;  %v755_v63 = vpop.f32.mrb[18].mxu1 }
 0x1e2   :  { %v787_v0 = vadd.f32 %v786_v60, %v785_v45  ;;  %v788_v1 = vsel %vm778_vm2, %v674_v62, 0.0  ;;  %v757_v2 = vpop.f32.mrb[19].mxu1  ;;  %v790_v5 = vsel %vm778_vm2, %v755_v63, 0.0 }
 0x1e3   :  { %v775_v4 = vadd.f32 %v774_v61, %v751_v56  ;;  %v792_v8 = vsel %vm778_vm2, %v757_v2, 0.0 }
 0x1e4   :  { %v789_v6 = vadd.f32 %v788_v1, %v787_v0 }
 0x1e5   :  { %776 = vadd.xlane.f32.xlu1 %v775_v4 }
 0x1e6   :  { %v791_v7 = vadd.f32 %v790_v5, %v789_v6 }
 0x1e8   :  { %v793_v9 = vadd.f32 %v792_v8, %v791_v7 }
 0x1ea   :  { %794 = vadd.xlane.f32.xlu0 %v793_v9 }
 0x26e   :  { %v768_v11 = vpop.xlane.xlu1 %767 }
 0x26f   :  { %v797_v12 = vmul.f32 0.0009765625, %v768_v11 }
 0x271   :  { %v800_v13 = vadd.f32 %v797_v12, %v18_v10 }
 0x272   :  { %v777_v15 = vpop.xlane.xlu1 %776 }
 0x273   :  { %804 = vst.msk [vmem:[%s1179_s2] sm:$0xff] %vm803_vm3, %v800_v13  ;;  %v798_v16 = vmul.f32 0.0009765625, %v777_v15 }
 0x275   :  { %v801_v17 = vadd.f32 %v798_v16, %v19_v14 }
 0x277   :  { %805 = vst.msk [vmem:[%s1179_s2 + $0x8] sm:$0xff] %vm803_vm3, %v801_v17  ;;  %v795_v19 = vpop.xlane.xlu0 %794 }
 0x278   :  { %v799_v20 = vmul.f32 0.0009765625, %v795_v19 }
 0x27a   :  { %v802_v21 = vadd.f32 %v799_v20, %v20_v18 }
 0x27c   :  { %807 = vst.msk [vmem:[%s1179_s2 + $0x10] sm:$0xf] %vm806_vm4, %v802_v21 }

</bundles_post_ra>
